<compile_context>
chip_gen: v6e
topology: v6e:2x2x1
jax: 0.10.0
libtpu: 0.0.40
codegen_flags: <defaults>
</compile_context>

<pallas_src>
import functools

import jax
import jax.numpy as jnp
from jax import lax
from jax.experimental import pallas as pl
from jax.experimental.pallas import tpu as pltpu


def _p2p_decoder_kernel(x_ref, wdw_ref, wpw_ref, bias_ref, out_ref, *, N, Cin, H, W):
    # x_ref   : (N*Cin, H*W)  flattened NCHW input (batch folded onto sublanes)
    # wdw_ref : (N*Cin, 9)    BN-folded depthwise 3x3 weights, tap index = kh*3+kw
    # wpw_ref : (Cout, Cin)   pointwise 1x1 weights (f32)
    # bias_ref: (Cout, 1)     BN shift routed through the pointwise conv (f32)
    # out_ref : (N, Cout, H*W) lane-dense NCHW output
    NC, HW = x_ref.shape

    x = x_ref[...].astype(jnp.float32)                          # (NC, HW), cast once

    # --- halo ("SAME" zero-pad) masks: computed exactly once per call ----------
    flat = lax.broadcasted_iota(jnp.int32, (NC, HW), 1)          # flattened pixel idx
    col = (flat & (W - 1)) if (W & (W - 1)) == 0 else (flat % W)
    mask_l = col >= 1                 # valid when reading left neighbour  (dw = -1)
    mask_r = col <= W - 2             # valid when reading right neighbour (dw = +1)
    mask_t = flat >= W                # valid when reading row above       (dh = -1)
    mask_b = flat < (H - 1) * W       # valid when reading row below       (dh = +1)

    # --- column-shifted, masked copies of x: 2 rolls + 2 selects total ---------
    x_m1 = jnp.where(mask_l, pltpu.roll(x, shift=1, axis=1), 0.0)       # x[.., w-1]
    x_p1 = jnp.where(mask_r, pltpu.roll(x, shift=HW - 1, axis=1), 0.0)  # x[.., w+1]
    xc = (x_m1, x, x_p1)                                                # kw = 0,1,2

    # BN-folded tap weights, loaded once; each (NC,1) column lane-broadcasts.
    w = wdw_ref[...]                                             # (NC, 9)

    def row_sum(kh):
        # Weighted sum over kw for one kernel row (no row shift applied yet).
        s = xc[0] * w[:, 3 * kh + 0:3 * kh + 1]
        s = s + xc[1] * w[:, 3 * kh + 1:3 * kh + 2]
        s = s + xc[2] * w[:, 3 * kh + 2:3 * kh + 3]
        return s

    # Depthwise 3x3: roll is linear, so one row roll + one row mask per kh = 0,2.
    acc = row_sum(1)                                                         # dh = 0
    acc = acc + jnp.where(mask_t, pltpu.roll(row_sum(0), shift=W, axis=1), 0.0)      # dh = -1
    acc = acc + jnp.where(mask_b, pltpu.roll(row_sum(2), shift=HW - W, axis=1), 0.0)  # dh = +1

    # --- pointwise 1x1 conv (+ folded BN bias), exact f32 on the VPU ----------
    # K = Cin is tiny, so Cout broadcast-FMAs beat a <2%-utilised MXU here.
    wpw = wpw_ref[...]                                           # (Cout, Cin)
    bias = bias_ref[...]                                         # (Cout, 1)
    for n in range(N):
        base = n * Cin
        y = bias + wpw[:, 0:1] * acc[base:base + 1, :]           # bias folded into FMA 0
        for c in range(1, Cin):
            y = y + wpw[:, c:c + 1] * acc[base + c:base + c + 1, :]
        out_ref[n] = y.astype(out_ref.dtype)


def init_params(key, input_channels, output_channels, dtype=jnp.float32):
    """Deterministic synthetic parameters matching the module's shapes."""
    k1, k2, k3, k4 = jax.random.split(key, 4)
    # depthwise conv weight: PyTorch (Cin, 1, 3, 3) -> stored as (3, 3, Cin)
    w_dw = 0.1 * jax.random.normal(k1, (3, 3, input_channels), dtype)
    # pointwise conv weight: PyTorch (Cout, Cin, 1, 1) -> stored as (Cin, Cout)
    w_pw = 0.1 * jax.random.normal(k2, (input_channels, output_channels), dtype)
    bn_gamma = 1.0 + 0.05 * jax.random.normal(k3, (input_channels,), dtype)
    bn_beta = 0.05 * jax.random.normal(k4, (input_channels,), dtype)
    bn_mean = 0.01 * jnp.arange(input_channels, dtype=dtype)
    bn_var = 1.0 + 0.02 * jnp.arange(input_channels, dtype=dtype)
    return dict(w_dw=w_dw, w_pw=w_pw, bn_gamma=bn_gamma, bn_beta=bn_beta,
                bn_mean=bn_mean, bn_var=bn_var)


def pixel2pixel_simple_decoder(x, x_features, x_list, params, *, eps=1e-5):
    """Mirrors PyTorch forward(x, x_features, x_list): only x_features is used."""
    del x, x_list  # unused, matching the reference forward()

    N, Cin, H, W = x_features.shape
    HW = H * W
    Cout = params["w_pw"].shape[1]

    # --- fold BatchNorm (eval mode) into the weights --------------------------
    scale = params["bn_gamma"] / jnp.sqrt(params["bn_var"] + eps)          # (Cin,)
    shift = params["bn_beta"] - params["bn_mean"] * scale                  # (Cin,)
    # depthwise weights scaled per channel, laid out (Cin, 9), tiled over batch.
    wdw_f = (params["w_dw"] * scale[None, None, :]).astype(jnp.float32)    # (3,3,Cin)
    wdw_f = jnp.tile(jnp.transpose(wdw_f.reshape(9, Cin)), (N, 1))         # (N*Cin, 9)
    # pointwise weights transposed for a lane-dense (Cout, HW) output, f32.
    wpw_t = jnp.transpose(params["w_pw"]).astype(jnp.float32)              # (Cout, Cin)
    # BN shift pushed through the 1x1 conv (exact in f32).
    bias = (shift @ params["w_pw"]).reshape(Cout, 1).astype(jnp.float32)   # (Cout, 1)

    # Free, contiguous reshape: batch*channels on sublanes, H*W on lanes.
    x_flat = x_features.reshape(N * Cin, HW)

    kernel = functools.partial(_p2p_decoder_kernel, N=N, Cin=Cin, H=H, W=W)

    itemsize = jnp.dtype(x_features.dtype).itemsize
    flops = 2 * N * HW * Cin * (9 + Cout)
    bytes_accessed = (itemsize * (N * Cin * HW + N * Cout * HW)
                      + 4 * (9 * N * Cin + Cout * Cin + Cout))
    cost = pl.CostEstimate(flops=flops, transcendentals=0,
                           bytes_accessed=bytes_accessed)

    vmem = pl.BlockSpec(memory_space=pltpu.MemorySpace.VMEM)
    out_flat = pl.pallas_call(
        kernel,
        out_shape=jax.ShapeDtypeStruct((N, Cout, HW), x_features.dtype),
        in_specs=[vmem, vmem, vmem, vmem],
        out_specs=vmem,
        cost_estimate=cost,
    )(x_flat, wdw_f, wpw_t, bias)

    # Output is already NCHW-ordered; only a free reshape is needed.
    return out_flat.reshape(N, Cout, H, W)


def _reference(x_features, params, eps=1e-5):
    """Pure-JAX (XLA conv, full-precision f32) reference for correctness checking."""
    Cin = params["w_dw"].shape[2]
    rhs_dw = jnp.transpose(params["w_dw"], (2, 0, 1))[:, None, :, :]  # (Cin,1,3,3)
    y = lax.conv_general_dilated(
        x_features, rhs_dw, (1, 1), "SAME",
        dimension_numbers=("NCHW", "OIHW", "NCHW"), feature_group_count=Cin,
        precision=lax.Precision.HIGHEST)
    scale = params["bn_gamma"] / jnp.sqrt(params["bn_var"] + eps)
    shift = params["bn_beta"] - params["bn_mean"] * scale
    y = y * scale[None, :, None, None] + shift[None, :, None, None]
    rhs_pw = jnp.transpose(params["w_pw"], (1, 0))[:, :, None, None]  # (Cout,Cin,1,1)
    return lax.conv_general_dilated(
        y, rhs_pw, (1, 1), "SAME", dimension_numbers=("NCHW", "OIHW", "NCHW"),
        precision=lax.Precision.HIGHEST)


if __name__ == "__main__":
    key = jax.random.PRNGKey(0)
    k_feat, k_x, k_params = jax.random.split(key, 3)

    N, Cin, H, W = 2, 4, 16, 16
    Cout = 8

    x = jax.random.normal(k_x, (N, Cin, H, W), jnp.float32)            # unused by forward
    x_features = jax.random.normal(k_feat, (N, Cin, H, W), jnp.float32)
    x_list = []                                                         # unused by forward

    params = init_params(k_params, Cin, Cout)

    out = pixel2pixel_simple_decoder(x, x_features, x_list, params)
    out = jax.block_until_ready(out)

    assert out.shape == (N, Cout, H, W), out.shape
    ref = jax.block_until_ready(_reference(x_features, params))
    max_err = float(jnp.max(jnp.abs(out - ref)))
    # All compute is f32 (bf16 MXU path removed), so tight agreement is expected.
    assert jnp.allclose(out, ref, atol=1e-4, rtol=1e-4), max_err

    print("KERNEL_OK")
</pallas_src>

<mosaic_0001>
module attributes {stable_mosaic.version = 11 : i64} {
  func.func @_p2p_decoder_kernel(%arg0: memref<8x256xf32, #tpu.memory_space<vmem>>, %arg1: memref<8x9xf32, #tpu.memory_space<vmem>>, %arg2: memref<8x4xf32, #tpu.memory_space<vmem>>, %arg3: memref<8x1xf32, #tpu.memory_space<vmem>>, %arg4: memref<2x8x256xf32, #tpu.memory_space<vmem>>) attributes {dimension_semantics = [], scalar_prefetch = 0 : i64, scratch_operands = 0 : i64, tpu.core_type = #tpu.core_type<tc>} {
    %c0 = arith.constant 0 : index
    %c0_0 = arith.constant 0 : index
    %0 = vector.load %arg0[%c0, %c0_0] : memref<8x256xf32, #tpu.memory_space<vmem>>, vector<8x256xf32>
    %1 = tpu.iota {dimensions = array<i32: 1>} : vector<8x256xi32>
    %c15_i32 = arith.constant 15 : i32
    %2 = vector.broadcast %c15_i32 : i32 to vector<8x256xi32>
    %3 = arith.andi %1, %2 : vector<8x256xi32>
    %c1_i32 = arith.constant 1 : i32
    %4 = vector.broadcast %c1_i32 : i32 to vector<8x256xi32>
    %5 = arith.cmpi sge, %3, %4 : vector<8x256xi32>
    %c14_i32 = arith.constant 14 : i32
    %6 = vector.broadcast %c14_i32 : i32 to vector<8x256xi32>
    %7 = arith.cmpi sle, %3, %6 : vector<8x256xi32>
    %c16_i32 = arith.constant 16 : i32
    %8 = vector.broadcast %c16_i32 : i32 to vector<8x256xi32>
    %9 = arith.cmpi sge, %1, %8 : vector<8x256xi32>
    %c240_i32 = arith.constant 240 : i32
    %10 = vector.broadcast %c240_i32 : i32 to vector<8x256xi32>
    %11 = arith.cmpi slt, %1, %10 : vector<8x256xi32>
    %c1_i32_1 = arith.constant 1 : i32
    %12 = tpu.dynamic_rotate %0 by %c1_i32_1 dim 1 : vector<8x256xf32>, i32 -> vector<8x256xf32>
    %cst = arith.constant 0.000000e+00 : f32
    %13 = vector.broadcast %cst : f32 to vector<8x256xf32>
    %14 = arith.select %5, %12, %13 : vector<8x256xi1>, vector<8x256xf32>
    %c255_i32 = arith.constant 255 : i32
    %15 = tpu.dynamic_rotate %0 by %c255_i32 dim 1 : vector<8x256xf32>, i32 -> vector<8x256xf32>
    %cst_2 = arith.constant 0.000000e+00 : f32
    %16 = vector.broadcast %cst_2 : f32 to vector<8x256xf32>
    %17 = arith.select %7, %15, %16 : vector<8x256xi1>, vector<8x256xf32>
    %c0_3 = arith.constant 0 : index
    %c0_4 = arith.constant 0 : index
    %18 = vector.load %arg1[%c0_3, %c0_4] : memref<8x9xf32, #tpu.memory_space<vmem>>, vector<8x9xf32>
    %19 = vector.extract_strided_slice %18 {offsets = [0, 3], sizes = [8, 1], strides = [1, 1]} : vector<8x9xf32> to vector<8x1xf32>
    %20 = vector.broadcast %19 : vector<8x1xf32> to vector<8x256xf32>
    %21 = arith.mulf %14, %20 : vector<8x256xf32>
    %22 = vector.extract_strided_slice %18 {offsets = [0, 4], sizes = [8, 1], strides = [1, 1]} : vector<8x9xf32> to vector<8x1xf32>
    %23 = vector.broadcast %22 : vector<8x1xf32> to vector<8x256xf32>
    %24 = arith.mulf %0, %23 : vector<8x256xf32>
    %25 = arith.addf %21, %24 : vector<8x256xf32>
    %26 = vector.extract_strided_slice %18 {offsets = [0, 5], sizes = [8, 1], strides = [1, 1]} : vector<8x9xf32> to vector<8x1xf32>
    %27 = vector.broadcast %26 : vector<8x1xf32> to vector<8x256xf32>
    %28 = arith.mulf %17, %27 : vector<8x256xf32>
    %29 = arith.addf %25, %28 : vector<8x256xf32>
    %30 = vector.extract_strided_slice %18 {offsets = [0, 0], sizes = [8, 1], strides = [1, 1]} : vector<8x9xf32> to vector<8x1xf32>
    %31 = vector.broadcast %30 : vector<8x1xf32> to vector<8x256xf32>
    %32 = arith.mulf %14, %31 : vector<8x256xf32>
    %33 = vector.extract_strided_slice %18 {offsets = [0, 1], sizes = [8, 1], strides = [1, 1]} : vector<8x9xf32> to vector<8x1xf32>
    %34 = vector.broadcast %33 : vector<8x1xf32> to vector<8x256xf32>
    %35 = arith.mulf %0, %34 : vector<8x256xf32>
    %36 = arith.addf %32, %35 : vector<8x256xf32>
    %37 = vector.extract_strided_slice %18 {offsets = [0, 2], sizes = [8, 1], strides = [1, 1]} : vector<8x9xf32> to vector<8x1xf32>
    %38 = vector.broadcast %37 : vector<8x1xf32> to vector<8x256xf32>
    %39 = arith.mulf %17, %38 : vector<8x256xf32>
    %40 = arith.addf %36, %39 : vector<8x256xf32>
    %c16_i32_5 = arith.constant 16 : i32
    %41 = tpu.dynamic_rotate %40 by %c16_i32_5 dim 1 : vector<8x256xf32>, i32 -> vector<8x256xf32>
    %cst_6 = arith.constant 0.000000e+00 : f32
    %42 = vector.broadcast %cst_6 : f32 to vector<8x256xf32>
    %43 = arith.select %9, %41, %42 : vector<8x256xi1>, vector<8x256xf32>
    %44 = arith.addf %29, %43 : vector<8x256xf32>
    %45 = vector.extract_strided_slice %18 {offsets = [0, 6], sizes = [8, 1], strides = [1, 1]} : vector<8x9xf32> to vector<8x1xf32>
    %46 = vector.broadcast %45 : vector<8x1xf32> to vector<8x256xf32>
    %47 = arith.mulf %14, %46 : vector<8x256xf32>
    %48 = vector.extract_strided_slice %18 {offsets = [0, 7], sizes = [8, 1], strides = [1, 1]} : vector<8x9xf32> to vector<8x1xf32>
    %49 = vector.broadcast %48 : vector<8x1xf32> to vector<8x256xf32>
    %50 = arith.mulf %0, %49 : vector<8x256xf32>
    %51 = arith.addf %47, %50 : vector<8x256xf32>
    %52 = vector.extract_strided_slice %18 {offsets = [0, 8], sizes = [8, 1], strides = [1, 1]} : vector<8x9xf32> to vector<8x1xf32>
    %53 = vector.broadcast %52 : vector<8x1xf32> to vector<8x256xf32>
    %54 = arith.mulf %17, %53 : vector<8x256xf32>
    %55 = arith.addf %51, %54 : vector<8x256xf32>
    %c240_i32_7 = arith.constant 240 : i32
    %56 = tpu.dynamic_rotate %55 by %c240_i32_7 dim 1 : vector<8x256xf32>, i32 -> vector<8x256xf32>
    %cst_8 = arith.constant 0.000000e+00 : f32
    %57 = vector.broadcast %cst_8 : f32 to vector<8x256xf32>
    %58 = arith.select %11, %56, %57 : vector<8x256xi1>, vector<8x256xf32>
    %59 = arith.addf %44, %58 : vector<8x256xf32>
    %c0_9 = arith.constant 0 : index
    %c0_10 = arith.constant 0 : index
    %60 = vector.load %arg2[%c0_9, %c0_10] : memref<8x4xf32, #tpu.memory_space<vmem>>, vector<8x4xf32>
    %c0_11 = arith.constant 0 : index
    %c0_12 = arith.constant 0 : index
    %61 = vector.load %arg3[%c0_11, %c0_12] : memref<8x1xf32, #tpu.memory_space<vmem>>, vector<8x1xf32>
    %62 = vector.extract_strided_slice %60 {offsets = [0, 0], sizes = [8, 1], strides = [1, 1]} : vector<8x4xf32> to vector<8x1xf32>
    %63 = vector.extract_strided_slice %59 {offsets = [0, 0], sizes = [1, 256], strides = [1, 1]} : vector<8x256xf32> to vector<1x256xf32>
    %64 = vector.broadcast %62 : vector<8x1xf32> to vector<8x256xf32>
    %65 = vector.broadcast %63 : vector<1x256xf32> to vector<8x256xf32>
    %66 = arith.mulf %64, %65 : vector<8x256xf32>
    %67 = vector.broadcast %61 : vector<8x1xf32> to vector<8x256xf32>
    %68 = arith.addf %67, %66 : vector<8x256xf32>
    %69 = vector.extract_strided_slice %60 {offsets = [0, 1], sizes = [8, 1], strides = [1, 1]} : vector<8x4xf32> to vector<8x1xf32>
    %70 = vector.extract_strided_slice %59 {offsets = [1, 0], sizes = [1, 256], strides = [1, 1]} : vector<8x256xf32> to vector<1x256xf32>
    %71 = vector.broadcast %69 : vector<8x1xf32> to vector<8x256xf32>
    %72 = vector.broadcast %70 : vector<1x256xf32> to vector<8x256xf32>
    %73 = arith.mulf %71, %72 : vector<8x256xf32>
    %74 = arith.addf %68, %73 : vector<8x256xf32>
    %75 = vector.extract_strided_slice %60 {offsets = [0, 2], sizes = [8, 1], strides = [1, 1]} : vector<8x4xf32> to vector<8x1xf32>
    %76 = vector.extract_strided_slice %59 {offsets = [2, 0], sizes = [1, 256], strides = [1, 1]} : vector<8x256xf32> to vector<1x256xf32>
    %77 = vector.broadcast %75 : vector<8x1xf32> to vector<8x256xf32>
    %78 = vector.broadcast %76 : vector<1x256xf32> to vector<8x256xf32>
    %79 = arith.mulf %77, %78 : vector<8x256xf32>
    %80 = arith.addf %74, %79 : vector<8x256xf32>
    %81 = vector.extract_strided_slice %60 {offsets = [0, 3], sizes = [8, 1], strides = [1, 1]} : vector<8x4xf32> to vector<8x1xf32>
    %82 = vector.extract_strided_slice %59 {offsets = [3, 0], sizes = [1, 256], strides = [1, 1]} : vector<8x256xf32> to vector<1x256xf32>
    %83 = vector.broadcast %81 : vector<8x1xf32> to vector<8x256xf32>
    %84 = vector.broadcast %82 : vector<1x256xf32> to vector<8x256xf32>
    %85 = arith.mulf %83, %84 : vector<8x256xf32>
    %86 = arith.addf %80, %85 : vector<8x256xf32>
    %c0_13 = arith.constant 0 : index
    %c0_14 = arith.constant 0 : index
    %c0_15 = arith.constant 0 : index
    %87 = vector.load %arg4[%c0_13, %c0_14, %c0_15] : memref<2x8x256xf32, #tpu.memory_space<vmem>>, vector<1x8x256xf32>
    %88 = vector.shape_cast %87 : vector<1x8x256xf32> to vector<8x256xf32>
    %89 = vector.shape_cast %86 : vector<8x256xf32> to vector<1x8x256xf32>
    tpu.vector_store %arg4[%c0_13, %c0_14, %c0_15], %89 {strides = array<i32>} : memref<2x8x256xf32, #tpu.memory_space<vmem>>, vector<1x8x256xf32>,
    %90 = vector.extract_strided_slice %60 {offsets = [0, 0], sizes = [8, 1], strides = [1, 1]} : vector<8x4xf32> to vector<8x1xf32>
    %91 = vector.extract_strided_slice %59 {offsets = [4, 0], sizes = [1, 256], strides = [1, 1]} : vector<8x256xf32> to vector<1x256xf32>
    %92 = vector.broadcast %90 : vector<8x1xf32> to vector<8x256xf32>
    %93 = vector.broadcast %91 : vector<1x256xf32> to vector<8x256xf32>
    %94 = arith.mulf %92, %93 : vector<8x256xf32>
    %95 = vector.broadcast %61 : vector<8x1xf32> to vector<8x256xf32>
    %96 = arith.addf %95, %94 : vector<8x256xf32>
    %97 = vector.extract_strided_slice %60 {offsets = [0, 1], sizes = [8, 1], strides = [1, 1]} : vector<8x4xf32> to vector<8x1xf32>
    %98 = vector.extract_strided_slice %59 {offsets = [5, 0], sizes = [1, 256], strides = [1, 1]} : vector<8x256xf32> to vector<1x256xf32>
    %99 = vector.broadcast %97 : vector<8x1xf32> to vector<8x256xf32>
    %100 = vector.broadcast %98 : vector<1x256xf32> to vector<8x256xf32>
    %101 = arith.mulf %99, %100 : vector<8x256xf32>
    %102 = arith.addf %96, %101 : vector<8x256xf32>
    %103 = vector.extract_strided_slice %60 {offsets = [0, 2], sizes = [8, 1], strides = [1, 1]} : vector<8x4xf32> to vector<8x1xf32>
    %104 = vector.extract_strided_slice %59 {offsets = [6, 0], sizes = [1, 256], strides = [1, 1]} : vector<8x256xf32> to vector<1x256xf32>
    %105 = vector.broadcast %103 : vector<8x1xf32> to vector<8x256xf32>
    %106 = vector.broadcast %104 : vector<1x256xf32> to vector<8x256xf32>
    %107 = arith.mulf %105, %106 : vector<8x256xf32>
    %108 = arith.addf %102, %107 : vector<8x256xf32>
    %109 = vector.extract_strided_slice %60 {offsets = [0, 3], sizes = [8, 1], strides = [1, 1]} : vector<8x4xf32> to vector<8x1xf32>
    %110 = vector.extract_strided_slice %59 {offsets = [7, 0], sizes = [1, 256], strides = [1, 1]} : vector<8x256xf32> to vector<1x256xf32>
    %111 = vector.broadcast %109 : vector<8x1xf32> to vector<8x256xf32>
    %112 = vector.broadcast %110 : vector<1x256xf32> to vector<8x256xf32>
    %113 = arith.mulf %111, %112 : vector<8x256xf32>
    %114 = arith.addf %108, %113 : vector<8x256xf32>
    %c1 = arith.constant 1 : index
    %c0_16 = arith.constant 0 : index
    %c0_17 = arith.constant 0 : index
    %115 = vector.load %arg4[%c1, %c0_16, %c0_17] : memref<2x8x256xf32, #tpu.memory_space<vmem>>, vector<1x8x256xf32>
    %116 = vector.shape_cast %115 : vector<1x8x256xf32> to vector<8x256xf32>
    %117 = vector.shape_cast %114 : vector<8x256xf32> to vector<1x8x256xf32>
    tpu.vector_store %arg4[%c1, %c0_16, %c0_17], %117 {strides = array<i32>} : memref<2x8x256xf32, #tpu.memory_space<vmem>>, vector<1x8x256xf32>,
    return
  }
}

</mosaic_0001>

<bundles_post_ra>
// kernel: tpu_custom_call.1
= control target key start
LH: loop header
LB: loop body
LE: loop exit
PB: predicated region body
PF: predicated region fallthrough
CT: control target
= control target key end

     0   :  { %9 = vsyncpa [#allocation3], 0  ;;  %s478_s0 = inlined_call_operand.vmem [shape: f32[8,256], index: 0, kind: input, shape index: {}]   ;;  %s479_s1 = inlined_call_operand.hbm [shape: f32[8,9], index: 1, kind: input, shape index: {}]   ;;  %s480_s2 = inlined_call_operand.vmem [shape: f32[8,4], index: 2, kind: input, shape index: {}]   ;;  %s481_s3 = inlined_call_operand.vmem [shape: f32[8,1], index: 3, kind: input, shape index: {}]   ;;  %s482_s4 = inlined_call_operand.hbm [shape: f32[2,8,256], index: 4, kind: output, shape index: {}]  }
   0x1   :  { %10 = vsyncpa [#allocation4], 0  ;;  %s370_s15 = smov [#allocation2]  }
   0x2   :  { %s19_s16 = sshll.u32 %s370_s15, 4  ;;  %s20_s16 = int_to_ptr.vmem [resolvable:$true] %s19_s16 }
   0x3   :  { %s334_s17 = scalar_lea.vmem %s20_s16, 128  ;;  %p339_p1 = scmp.lt.s32.totalorder %s20_s16, %s20_s16 }
   0x4   :  { %p335_p0 = scmp.ne.s32.totalorder %s20_s16, %s334_s17  ;;  %p340_p2 = scmp.lt.s32.totalorder %s334_s17, %s334_s17 }
   0x6   :  { %p341_p3 = por %p340_p2, %p339_p1 }
   0x8   :  { %p342_p4 = pnand %p341_p3, %p335_p0 }
   0xa   :  { %345 = shalt.err (!%p342_p4)
}
   0xb   :  { %22 = dma.hbm_to_vmem [thread:$0]  %s479_s1, 128, %s20_s16, [#allocation3]  }
   0xc   :  { %366 = dma.done.wait [#allocation3], 128  }
   0xd   :  { %367 = vsyncadd [#allocation3], 4294967168  ;;  %v371_v0 = vmov 2   ;;  %v372_v1 = vmov 0   ;;  %v63_v2 = vld [vmem:[#allocation2] sm:$0xff]  ;;  %v373_v3 = vmov 6   ;;  %v32_v12 = vlaneseq }
   0xe   :  { %313 = vset.pattern.permute.xlu1 %v371_v0  ;;  %311 = vset.pattern.permute.xlu0 %v372_v1  ;;  %v374_v4 = vmov 1   ;;  %v419_v5 = vld [vmem:[%s478_s0] sm:$0xff]  ;;  %v375_v6 = vmov 7   ;;  %s376_s1 = smov 1   ;;  %v377_v7 = vmov 8   ;;  %v425_v8 = vld [vmem:[%s478_s0 + $0x8] sm:$0xff] }
   0xf   :  { %102 = vperm.xlu1 %313, %v63_v2   ;;  %88 = vperm.xlu0 %311, %v63_v2   ;;  %v378_v9 = vmov 4   ;;  %v379_v10 = vmov 3   ;;  %s380_s24 = smov 127   ;;  %v381_v11 = vmov 5   ;;  %v432_v15 = vand.u32 127, %v32_v12  ;;  %s382_s0 = smov 16  }
  0x10   :  { %v154_v56 = vld [vmem:[%s481_s3] sm:$0xff]  ;;  %s383_s27 = smov 112  }
  0x11   :  { %v435_v17 = vadd.s32 128, %v432_v15  ;;  %v35_v20 = vand.u32 15, %v432_v15  ;;  %vm49_vm0 = vcmp.lt.s32.totalorder %v432_v15, 1  ;;  %vm58_vm5 = vcmp.lt.s32.totalorder %v432_v15, 127 }
  0x12   :  { %vm113_vm6 = vcmp.lt.s32.totalorder %v432_v15, 16  ;;  %vm41_vm7 = vcmp.ge.s32.totalorder %v432_v15, 16  ;;  %vm146_vm8 = vcmp.lt.s32.totalorder %v432_v15, 112 }
  0x13   :  { %314 = vset.pattern.permute.xlu1 %v373_v3  ;;  %312 = vset.pattern.permute.xlu0 %v374_v4  ;;  %v36_v21 = vand.u32 15, %v435_v17  ;;  %vm37_vm1 = vcmp.ge.s32.totalorder %v35_v20, 1  ;;  %vm39_vm3 = vcmp.le.s32.totalorder %v35_v20, 14  ;;  %vm44_vm9 = vcmp.lt.s32.totalorder %v435_v17, 240 }
  0x14   :  { %121 = vperm.xlu1 %314, %v63_v2   ;;  %94 = vperm.xlu0 %312, %v63_v2  }
  0x15   :  { %vm38_vm2 = vcmp.ge.s32.totalorder %v36_v21, 1  ;;  %vm40_vm4 = vcmp.le.s32.totalorder %v36_v21, 14 }
  0x18   :  { %315 = vset.pattern.permute.xlu1 %v375_v6  ;;  %45 = vrot.lane.b32.xlu0 %v419_v5, %s376_s1  ;;  %v153_v6 = vld [vmem:[%s480_s2] sm:$0xff]  ;;  %s384_s2 = smov [#allocation5]  }
  0x19   :  { %127 = vperm.xlu1 %315, %v63_v2   ;;  %316 = vset.pattern.permute.xlu0 %v377_v7  ;;  %s283_s3 = sshll.u32 %s384_s2, 4  ;;  %s284_s3 = int_to_ptr.vmem [resolvable:$true] %s283_s3 }
  0x1a   :  { %s346_s30 = scalar_lea.vmem %s284_s3, 512  ;;  %p351_p6 = scmp.lt.s32.totalorder %s284_s3, %s284_s3 }
  0x1b   :  { %p347_p5 = scmp.ne.s32.totalorder %s284_s3, %s346_s30  ;;  %p352_p7 = scmp.lt.s32.totalorder %s346_s30, %s346_s30 }
  0x1c   :  { %135 = vperm.xlu0 %316, %v63_v2  }
  0x1d   :  { %47 = vrot.lane.b32.xlu1 %v425_v8, %s376_s1  ;;  %p353_p8 = por %p352_p7, %p351_p6 }
  0x1e   :  { %318 = vset.pattern.permute.xlu1 %v378_v9 }
  0x1f   :  { %p354_p9 = pnand %p353_p8, %p347_p5 }
  0x20   :  { %317 = vset.pattern.permute.xlu0 %v379_v10 }
  0x21   :  { %54 = vrot.lane.b32.xlu1 %v419_v5, %s380_s24  ;;  %66 = vperm.xlu0 %317, %v63_v2  }
  0x25   :  { %56 = vrot.lane.b32.xlu1 %v425_v8, %s380_s24  ;;  %320 = vset.pattern.permute.xlu0 %v372_v1 }
  0x29   :  { %72 = vperm.xlu1 %318, %v63_v2  }
  0x2d   :  { %319 = vset.pattern.permute.xlu1 %v381_v11 }
  0x2e   :  { %80 = vperm.xlu1 %319, %v63_v2  }
  0x32   :  { %321 = vset.pattern.permute.xlu1 %v372_v1 }
  0x8a   :  { %v103_v13 = vpop.permute.xlu1 %102  ;;  %v89_v14 = vpop.permute.xlu0 %88 }
  0x8f   :  { %v122_v16 = vpop.permute.xlu1 %121  ;;  %v95_v18 = vpop.permute.xlu0 %94 }
  0x90   :  { %v97_v29 = vmul.f32 %v95_v18, %v419_v5  ;;  %v98_v30 = vmul.f32 %v95_v18, %v425_v8 }
  0x93   :  { %v46_v22 = vpop.permute.xlu0 %45 }
  0x94   :  { %v128_v19 = vpop.permute.xlu1 %127 }
  0x95   :  { %v130_v45 = vmul.f32 %v128_v19, %v419_v5  ;;  %v131_v57 = vmul.f32 %v128_v19, %v425_v8 }
  0x97   :  { %v136_v33 = vpop.permute.xlu0 %135 }
  0x98   :  { %v48_v23 = vpop.permute.xlu1 %47 }
  0x99   :  { %v50_v24 = vsel %vm49_vm0, %v46_v22, %v48_v23  ;;  %v51_v25 = vsel %vm49_vm0, %v48_v23, %v46_v22 }
  0x9a   :  { %v52_v26 = vsel %vm37_vm1, %v51_v25, 0.0  ;;  %v53_v27 = vsel %vm38_vm2, %v50_v24, 0.0 }
  0x9b   :  { %v91_v31 = vmul.f32 %v89_v14, %v52_v26  ;;  %v92_v32 = vmul.f32 %v89_v14, %v53_v27  ;;  %v124_v37 = vmul.f32 %v122_v16, %v52_v26  ;;  %v125_v52 = vmul.f32 %v122_v16, %v53_v27 }
  0x9c   :  { %v55_v28 = vpop.permute.xlu1 %54  ;;  %v67_v46 = vpop.permute.xlu0 %66 }
  0x9d   :  { %v100_v42 = vadd.f32 %v98_v30, %v92_v32  ;;  %v99_v43 = vadd.f32 %v97_v29, %v91_v31  ;;  %v132_v53 = vadd.f32 %v130_v45, %v124_v37  ;;  %v69_v54 = vmul.f32 %v67_v46, %v52_v26 }
  0x9e   :  { %v70_v55 = vmul.f32 %v67_v46, %v53_v27  ;;  %v133_v2 = vadd.f32 %v131_v57, %v125_v52 }
  0xa0   :  { %v57_v34 = vpop.permute.xlu1 %56 }
  0xa1   :  { %v59_v35 = vsel %vm58_vm5, %v55_v28, %v57_v34  ;;  %v60_v36 = vsel %vm58_vm5, %v57_v34, %v55_v28 }
  0xa2   :  { %v61_v38 = vsel %vm39_vm3, %v59_v35, 0.0  ;;  %v62_v39 = vsel %vm40_vm4, %v60_v36, 0.0 }
  0xa3   :  { %v105_v40 = vmul.f32 %v103_v13, %v61_v38  ;;  %v106_v41 = vmul.f32 %v103_v13, %v62_v39  ;;  %v138_v47 = vmul.f32 %v136_v33, %v61_v38  ;;  %v139_v58 = vmul.f32 %v136_v33, %v62_v39 }
  0xa4   :  { %v73_v44 = vpop.permute.xlu1 %72  ;;  %v462_v13 = vshrl.u32 %v32_v12, 7 }
  0xa5   :  { %v108_v48 = vadd.f32 %v106_v41, %v100_v42  ;;  %v107_v49 = vadd.f32 %v105_v40, %v99_v43  ;;  %v75_v50 = vmul.f32 %v73_v44, %v419_v5  ;;  %v76_v51 = vmul.f32 %v73_v44, %v425_v8 }
  0xa6   :  { %v140_v60 = vadd.f32 %v138_v47, %v132_v53  ;;  %v141_v7 = vadd.f32 %v139_v58, %v133_v2  ;;  %v229_v20 = vsub.s32 4, %v462_v13  ;;  %v183_v21 = vsub.s32 1, %v462_v13 }
  0xa7   :  { %111 = vrot.lane.b32.xlu1 %v108_v48, %s382_s0  ;;  %109 = vrot.lane.b32.xlu0 %v107_v49, %s382_s0  ;;  %v77_v61 = vadd.f32 %v75_v50, %v69_v54  ;;  %v78_v62 = vadd.f32 %v76_v51, %v70_v55  ;;  %v241_v22 = vsub.s32 5, %v462_v13  ;;  %v199_v15 = vsub.s32 2, %v462_v13 }
  0xa8   :  { %v253_v17 = vsub.s32 6, %v462_v13  ;;  %v215_v29 = vsub.s32 3, %v462_v13  ;;  %v265_v30 = vsub.s32 7, %v462_v13 }
  0xa9   :  { %v81_v59 = vpop.permute.xlu1 %80 }
  0xaa   :  { %v83_v63 = vmul.f32 %v81_v59, %v61_v38  ;;  %v84_v1 = vmul.f32 %v81_v59, %v62_v39 }
  0xab   :  { %172 = vperm.xlu1 %321, %v154_v56   ;;  %142 = vrot.lane.b32.xlu0 %v140_v60, %s383_s27 }
  0xac   :  { %v85_v3 = vadd.f32 %v83_v63, %v77_v61  ;;  %v86_v5 = vadd.f32 %v84_v1, %v78_v62 }
  0xaf   :  { %144 = vrot.lane.b32.xlu1 %v141_v7, %s383_s27  ;;  %157 = vperm.xlu0 %320, %v153_v6  }
  0xb0   :  { %322 = vset.pattern.permute.xlu1 %v374_v4 }
  0xb3   :  { %178 = vperm.xlu1 %322, %v153_v6   ;;  %323 = vset.pattern.permute.xlu0 %v371_v0 }
  0xb4   :  { %194 = vperm.xlu0 %323, %v153_v6  }
  0xb7   :  { %324 = vset.pattern.permute.xlu1 %v379_v10 }
  0xb8   :  { %210 = vperm.xlu1 %324, %v153_v6   ;;  %325 = vset.pattern.permute.xlu0 %v379_v10  ;;  %v162_v10 = vsub.s32 0, %v462_v13 }
 0x119   :  { %v112_v8 = vpop.permute.xlu1 %111  ;;  %v110_v9 = vpop.permute.xlu0 %109 }
 0x11a   :  { %v115_v11 = vsel %vm113_vm6, %v112_v8, %v110_v9  ;;  %v114_v0 = vsel %vm113_vm6, %v110_v9, %v112_v8 }
 0x11b   :  { %v116_v14 = vsel %vm41_vm7, %v115_v11, 0.0  ;;  %v119_v12 = vadd.f32 %v114_v0, %v86_v5 }
 0x11c   :  { %v118_v18 = vadd.f32 %v116_v14, %v85_v3 }
 0x11d   :  { %v143_v16 = vpop.permute.xlu0 %142 }
 0x126   :  { %v173_v4 = vpop.permute.xlu1 %172 }
 0x12a   :  { %v145_v19 = vpop.permute.xlu1 %144  ;;  %v158_v25 = vpop.permute.xlu0 %157 }
 0x12b   :  { %v147_v23 = vsel %vm146_vm8, %v143_v16, %v145_v19  ;;  %v148_v24 = vsel %vm146_vm8, %v145_v19, %v143_v16 }
 0x12c   :  { %v150_v26 = vsel %vm44_vm9, %v148_v24, 0.0  ;;  %v151_v27 = vadd.f32 %v147_v23, %v118_v18 }
 0x12d   :  { %v152_v28 = vadd.f32 %v150_v26, %v119_v12 }
 0x12e   :  { %v163_v31 = vrot.slane %v151_v27, %v162_v10  ;;  %v230_v32 = vrot.slane %v151_v27, %v229_v20  ;;  %v179_v33 = vpop.permute.xlu1 %178  ;;  %v184_v34 = vrot.slane %v151_v27, %v183_v21  ;;  %v242_v35 = vrot.slane %v151_v27, %v241_v22 }
 0x12f   :  { %v167_v36 = vrot.slane %v152_v28, %v162_v10  ;;  %v234_v37 = vrot.slane %v152_v28, %v229_v20  ;;  %v188_v38 = vrot.slane %v152_v28, %v183_v21  ;;  %v246_v39 = vrot.slane %v152_v28, %v241_v22  ;;  %v195_v48 = vpop.permute.xlu0 %194 }
 0x130   :  { %v168_v40 = vmul.f32 %v163_v31, %v158_v25  ;;  %v235_v41 = vmul.f32 %v230_v32, %v158_v25  ;;  %v189_v42 = vmul.f32 %v184_v34, %v179_v33  ;;  %v247_v43 = vmul.f32 %v242_v35, %v179_v33 }
 0x131   :  { %v169_v44 = vmul.f32 %v167_v36, %v158_v25  ;;  %v236_v45 = vmul.f32 %v234_v37, %v158_v25  ;;  %v190_v46 = vmul.f32 %v188_v38, %v179_v33  ;;  %v248_v47 = vmul.f32 %v246_v39, %v179_v33 }
 0x132   :  { %v175_v49 = vadd.f32 %v173_v4, %v168_v40  ;;  %v237_v50 = vadd.f32 %v235_v41, %v173_v4  ;;  %v200_v51 = vrot.slane %v151_v27, %v199_v15  ;;  %v204_v52 = vrot.slane %v152_v28, %v199_v15 }
 0x133   :  { %v176_v53 = vadd.f32 %v173_v4, %v169_v44  ;;  %v238_v54 = vadd.f32 %v236_v45, %v173_v4  ;;  %v254_v55 = vrot.slane %v151_v27, %v253_v17  ;;  %v258_v56 = vrot.slane %v152_v28, %v253_v17  ;;  %v211_v2 = vpop.permute.xlu1 %210 }
 0x134   :  { %v191_v57 = vadd.f32 %v189_v42, %v175_v49  ;;  %v249_v58 = vadd.f32 %v247_v43, %v237_v50  ;;  %v205_v59 = vmul.f32 %v200_v51, %v195_v48  ;;  %v206_v60 = vmul.f32 %v204_v52, %v195_v48 }
 0x135   :  { %v192_v61 = vadd.f32 %v190_v46, %v176_v53  ;;  %v250_v62 = vadd.f32 %v248_v47, %v238_v54  ;;  %v259_v63 = vmul.f32 %v254_v55, %v195_v48  ;;  %v260_v1 = vmul.f32 %v258_v56, %v195_v48 }
 0x136   :  { %v207_v3 = vadd.f32 %v205_v59, %v191_v57  ;;  %v216_v5 = vrot.slane %v151_v27, %v215_v29  ;;  %v220_v6 = vrot.slane %v152_v28, %v215_v29  ;;  %v266_v7 = vrot.slane %v151_v27, %v265_v30 }
 0x137   :  { %v208_v8 = vadd.f32 %v206_v60, %v192_v61  ;;  %v261_v9 = vadd.f32 %v259_v63, %v249_v58  ;;  %v262_v11 = vadd.f32 %v260_v1, %v250_v62  ;;  %v270_v13 = vrot.slane %v152_v28, %v265_v30 }
 0x138   :  { %v221_v4 = vmul.f32 %v216_v5, %v211_v2  ;;  %v222_v14 = vmul.f32 %v220_v6, %v211_v2  ;;  %v271_v16 = vmul.f32 %v266_v7, %v211_v2 }
 0x139   :  { %v272_v0 = vmul.f32 %v270_v13, %v211_v2 }
 0x13a   :  { %v223_v10 = vadd.f32 %v221_v4, %v207_v3  ;;  %v224_v18 = vadd.f32 %v222_v14, %v208_v8  ;;  %v273_v19 = vadd.f32 %v271_v16, %v261_v9 }
 0x13b   :  { %v274_v20 = vadd.f32 %v272_v0, %v262_v11 }
 0x13c   :  { %225 = vst [vmem:[#allocation5] sm:$0xff] %v223_v10  ;;  %226 = vst [vmem:[#allocation5 + $0x8] sm:$0xff] %v224_v18 }
 0x13d   :  { %276 = vst [vmem:[#allocation5 + $0x10] sm:$0xff] %v273_v19  ;;  %277 = vst [vmem:[#allocation5 + $0x18] sm:$0xff] %v274_v20 }
 0x13e   :  { %357 = shalt.err (!%p354_p9)
}
 0x13f   :  { %s385_s5 = smov 256  }
 0x140   :  { %289 = dma.vmem_to_hbm [thread:$0]  %s284_s3, 512, %s482_s4, [#allocation4], %s385_s5, %s385_s5, %s382_s0  }
 0x141   :  { %368 = dma.done.wait [#allocation4], 512  }
 0x142   :  { %369 = vsyncadd [#allocation4], 4294966784 }
 0x143   :  { %293 = vsyncpa [#allocation3], 1 }
 0x144   :  { %294 = vsyncpa [#allocation4], 1 }

</bundles_post_ra>
